<compile_context>
chip_gen: v7x
topology: tpu7x:2x2x1
jax: 0.10.0
libtpu: 0.0.40
codegen_flags: <defaults>
</compile_context>

<pallas_src>
import jax
import jax.numpy as jnp
from jax import lax
from jax.experimental import pallas as pl
from jax.experimental.pallas import tpu as pltpu


def _round_up(x, m):
    return ((x + m - 1) // m) * m


def _min_sublane(dtype):
    # (8, 128) min tile for 32-bit dtypes, (16, 128) for 16-bit, (32, 128) for 8-bit.
    itemsize = jnp.dtype(dtype).itemsize
    return max(8, 32 // itemsize)


def _make_dice_kernel(s, spatial_tile, k_per_p):
    n_chunks = spatial_tile // 128
    unroll = max(1, min(8, n_chunks))

    def kernel(p_ref, t_ref, o_pt, o_pp, o_tt):
        k = pl.program_id(2)

        @pl.when(k == 0)
        def _init():
            o_pt[...] = jnp.zeros_like(o_pt)
            o_pp[...] = jnp.zeros_like(o_pp)
            o_tt[...] = jnp.zeros_like(o_tt)

        # Global spatial block index (unclamped).  The index_map clamps the
        # DMA so it never reads out of bounds; blocks that land fully past
        # `s` (only possible for the odd-k_total p-split case) get rem <= 0
        # and are masked to zero below.
        jb = pl.program_id(0) * k_per_p + k
        rem = s - jb * spatial_tile          # number of valid lanes in block
        rows = p_ref.shape[0]

        def accumulate(masked):
            col = lax.broadcasted_iota(jnp.int32, (rows, 128), 1)

            def body(c, carry):
                pt, pp, tt = carry
                off = pl.multiple_of(c * 128, 128)
                pc = p_ref[:, pl.ds(off, 128)].astype(jnp.float32)
                tc = t_ref[:, pl.ds(off, 128)].astype(jnp.float32)
                if masked:
                    valid = (col + c * 128) < rem
                    pc = jnp.where(valid, pc, 0.0)
                    tc = jnp.where(valid, tc, 0.0)
                return pt + pc * tc, pp + pc * pc, tt + tc * tc

            zero = jnp.zeros((rows, 128), jnp.float32)
            pt, pp, tt = lax.fori_loop(0, n_chunks, body, (zero, zero, zero),
                                       unroll=unroll)
            o_pt[0] += pt
            o_pp[0] += pp
            o_tt[0] += tt

        # Steady state (full block): no masking ops at all.
        @pl.when(rem >= spatial_tile)
        def _full():
            accumulate(masked=False)

        # Ragged / overrun block: mask lanes past the valid length.
        @pl.when(rem < spatial_tile)
        def _tail():
            accumulate(masked=True)

    return kernel


def el_dice_loss(pred, target, *, max_spatial_tile=32768, max_row_tile=32):
    """Equivalent of ELDiceLoss().forward(pred, target) for 5-D NCDHW inputs."""
    n, ch = pred.shape[0], pred.shape[1]
    s = 1
    for d in pred.shape[2:]:
        s *= d
    nc = n * ch

    p_item = jnp.dtype(pred.dtype).itemsize
    t_item = jnp.dtype(target.dtype).itemsize
    sub = max(_min_sublane(pred.dtype), _min_sublane(target.dtype))

    # Row tiling: a block dim equal to the full array dim is exempt from the
    # /8 rule, so small nc gets a single exact row block (no padding needed).
    if nc <= max(max_row_tile, sub):
        row_tile = nc
    else:
        row_tile = _round_up(max_row_tile, sub)
    row_blocks = pl.cdiv(nc, row_tile)
    nc_pad = row_blocks * row_tile          # only the (tiny) OUTPUT is padded

    spatial_tile = min(max_spatial_tile, _round_up(s, 128))
    k_total = pl.cdiv(s, spatial_tile)

    # Megacore (v7x) balance: split the spatial reduction when the number of
    # parallel row blocks is odd, but only when the split adds no (even
    # k_total) or negligible (>=16 blocks) extra HBM traffic.
    if row_blocks % 2 == 1 and k_total >= 2 and (k_total % 2 == 0 or k_total >= 16):
        p_split = 2
    else:
        p_split = 1
    k_per_p = pl.cdiv(k_total, p_split)

    p2 = pred.reshape(nc, s)
    t2 = target.reshape(nc, s)

    def in_index_map(p, i, k):
        # Clamp so an overrun block (fully masked in-kernel) never DMAs OOB.
        return (i, jnp.minimum(p * k_per_p + k, k_total - 1))

    out_sds = jax.ShapeDtypeStruct((p_split, nc_pad, 128), jnp.float32)
    out_specs = tuple(
        pl.BlockSpec((1, row_tile, 128), lambda p, i, k: (p, i, 0))
        for _ in range(3)
    )

    # VMEM budget: 2 inputs x 2 pipeline buffers x block, plus headroom;
    # capped at 48 MiB so it stays safe on v7x's 64 MiB VMEM.
    block_bytes = row_tile * spatial_tile * (p_item + t_item)
    vmem_limit = int(min(max(2 * block_bytes + (8 << 20), 32 << 20), 48 << 20))

    pt_p, pp_p, tt_p = pl.pallas_call(
        _make_dice_kernel(s, spatial_tile, k_per_p),
        out_shape=(out_sds, out_sds, out_sds),
        grid_spec=pltpu.PrefetchScalarGridSpec(
            num_scalar_prefetch=0,
            grid=(p_split, row_blocks, k_per_p),
            in_specs=[
                pl.BlockSpec((row_tile, spatial_tile), in_index_map),
                pl.BlockSpec((row_tile, spatial_tile), in_index_map),
            ],
            out_specs=out_specs,
        ),
        compiler_params=pltpu.CompilerParams(
            dimension_semantics=("parallel", "parallel", "arbitrary"),
            vmem_limit_bytes=vmem_limit,
        ),
        cost_estimate=pl.CostEstimate(
            flops=6 * nc * s,
            transcendentals=0,
            bytes_accessed=nc * s * (p_item + t_item)
            + 3 * p_split * nc_pad * 128 * 4,
        ),
    )(p2, t2)

    # Tiny O(nc*128) epilogue in plain JAX: fold p-split partials and the
    # per-lane partial sums, then dice ratio / log / pow / clamp / mean.
    inter = jnp.sum(pt_p, axis=(0, 2))[:nc].reshape(n, ch)   # sum(p*t)
    psq = jnp.sum(pp_p, axis=(0, 2))[:nc].reshape(n, ch)     # sum(p^2)
    tsq = jnp.sum(tt_p, axis=(0, 2))[:nc].reshape(n, ch)     # sum(t^2)

    smooth = 1.0
    dice = jnp.sum(2.0 * inter / (psq + tsq + smooth), axis=1) / ch   # (n,)
    # NOTE: like the PyTorch reference, -log(dice + 1e-5) can go slightly
    # negative when dice ~ 1, making pow(., 0.3) NaN; semantics preserved.
    return jnp.clip(jnp.mean(jnp.power(-jnp.log(dice + 1e-5), 0.3)), 0.0, 2.0)


def _ref_loss(pred, target):
    """Pure-JAX reference mirroring the PyTorch module."""
    n, ch = pred.shape[0], pred.shape[1]
    p = pred.reshape(n, ch, -1).astype(jnp.float32)
    t = target.reshape(n, ch, -1).astype(jnp.float32)
    inter = jnp.sum(p * t, axis=-1)
    psq = jnp.sum(p * p, axis=-1)
    tsq = jnp.sum(t * t, axis=-1)
    dice = jnp.sum(2.0 * inter / (psq + tsq + 1.0), axis=1) / ch
    return jnp.clip(jnp.mean(jnp.power(-jnp.log(dice + 1e-5), 0.3)), 0.0, 2.0)


if __name__ == "__main__":
    key = jax.random.PRNGKey(0)

    def _mk(shape, k):
        k1, k2 = jax.random.split(k)
        pred = jax.nn.sigmoid(jax.random.normal(k1, shape, jnp.float32))
        target = (jax.random.uniform(k2, shape) > 0.5).astype(jnp.float32)
        return pred, target

    # Small NCDHW shapes exercising every code path:
    cases = [
        ((2, 4, 4, 8, 16), {}),                            # aligned, single block
        ((3, 5, 3, 7, 11), {}),                            # ragged spatial, non-/8 rows
        ((2, 4, 4, 8, 64), dict(max_spatial_tile=512)),    # multi-k + megacore p-split
        ((5, 9, 1, 3, 50), {}),                            # ragged row tail (2 row blocks)
        ((1, 2, 2, 8, 136), dict(max_spatial_tile=128)),   # odd k_total, clamped tail block
    ]
    keys = jax.random.split(key, len(cases))
    for (shape, kwargs), kk in zip(cases, keys):
        pred, target = _mk(shape, kk)
        fn = jax.jit(lambda p, t, kw=kwargs: el_dice_loss(p, t, **kw))
        loss = fn(pred, target)
        jax.block_until_ready(loss)
        ref = _ref_loss(pred, target)
        assert jnp.allclose(loss, ref, rtol=1e-4, atol=1e-5), (shape, loss, ref)
    print("KERNEL_OK")
</pallas_src>

<mosaic_0001>
module attributes {stable_mosaic.version = 11 : i64} {
  func.func @kernel(%arg0: i32, %arg1: i32, %arg2: i32, %arg3: memref<8x512xf32, #tpu.memory_space<vmem>>, %arg4: memref<8x512xf32, #tpu.memory_space<vmem>>, %arg5: memref<1x8x128xf32, #tpu.memory_space<vmem>>, %arg6: memref<1x8x128xf32, #tpu.memory_space<vmem>>, %arg7: memref<1x8x128xf32, #tpu.memory_space<vmem>>) attributes {dimension_semantics = [#tpu.dimension_semantics<parallel>, #tpu.dimension_semantics<parallel>, #tpu.dimension_semantics<arbitrary>], iteration_bounds = array<i64: 1, 1, 1>, scalar_prefetch = 0 : i64, scratch_operands = 0 : i64, tpu.core_type = #tpu.core_type<tc>, window_params = [{transform_indices = @transform_0, window_bounds = array<i64: 8, 512>}, {transform_indices = @transform_1, window_bounds = array<i64: 8, 512>}, {transform_indices = @transform_2, window_bounds = array<i64: 1, 8, 128>}, {transform_indices = @transform_3, window_bounds = array<i64: 1, 8, 128>}, {transform_indices = @transform_4, window_bounds = array<i64: 1, 8, 128>}]} {
    %c0_i32 = arith.constant 0 : i32
    %0 = arith.cmpi eq, %arg2, %c0_i32 : i32
    %1 = arith.extui %0 : i1 to i32
    %c0_i32_0 = arith.constant 0 : i32
    %2 = arith.cmpi ne, %1, %c0_i32_0 : i32
    scf.if %2 {
      %cst = arith.constant 0.000000e+00 : f32
      %13 = vector.broadcast %cst : f32 to vector<1x8x128xf32>
      %c0 = arith.constant 0 : index
      %c0_6 = arith.constant 0 : index
      %c0_7 = arith.constant 0 : index
      %14 = vector.load %arg5[%c0, %c0_6, %c0_7] : memref<1x8x128xf32, #tpu.memory_space<vmem>>, vector<1x8x128xf32>
      tpu.vector_store %arg5[%c0, %c0_6, %c0_7], %13 {strides = array<i32>} : memref<1x8x128xf32, #tpu.memory_space<vmem>>, vector<1x8x128xf32>,
      %cst_8 = arith.constant 0.000000e+00 : f32
      %15 = vector.broadcast %cst_8 : f32 to vector<1x8x128xf32>
      %c0_9 = arith.constant 0 : index
      %c0_10 = arith.constant 0 : index
      %c0_11 = arith.constant 0 : index
      %16 = vector.load %arg6[%c0_9, %c0_10, %c0_11] : memref<1x8x128xf32, #tpu.memory_space<vmem>>, vector<1x8x128xf32>
      tpu.vector_store %arg6[%c0_9, %c0_10, %c0_11], %15 {strides = array<i32>} : memref<1x8x128xf32, #tpu.memory_space<vmem>>, vector<1x8x128xf32>,
      %cst_12 = arith.constant 0.000000e+00 : f32
      %17 = vector.broadcast %cst_12 : f32 to vector<1x8x128xf32>
      %c0_13 = arith.constant 0 : index
      %c0_14 = arith.constant 0 : index
      %c0_15 = arith.constant 0 : index
      %18 = vector.load %arg7[%c0_13, %c0_14, %c0_15] : memref<1x8x128xf32, #tpu.memory_space<vmem>>, vector<1x8x128xf32>
      tpu.vector_store %arg7[%c0_13, %c0_14, %c0_15], %17 {strides = array<i32>} : memref<1x8x128xf32, #tpu.memory_space<vmem>>, vector<1x8x128xf32>,
    } else {
    }
    %c1_i32 = arith.constant 1 : i32
    %3 = arith.muli %arg0, %c1_i32 : i32
    %4 = arith.addi %3, %arg2 : i32
    %c512_i32 = arith.constant 512 : i32
    %5 = arith.muli %4, %c512_i32 : i32
    %c512_i32_1 = arith.constant 512 : i32
    %6 = arith.subi %c512_i32_1, %5 : i32
    %c512_i32_2 = arith.constant 512 : i32
    %7 = arith.cmpi sge, %6, %c512_i32_2 : i32
    %8 = arith.extui %7 : i1 to i32
    %c0_i32_3 = arith.constant 0 : i32
    %9 = arith.cmpi ne, %8, %c0_i32_3 : i32
    scf.if %9 {
      %cst = arith.constant 0.000000e+00 : f32
      %13 = vector.broadcast %cst : f32 to vector<8x128xf32>
      %c0_i32_6 = arith.constant 0 : i32
      %c128_i32 = arith.constant 128 : i32
      %14 = arith.muli %c0_i32_6, %c128_i32 : i32
      %15 = tpu.assume_multiple %14, 128 : i32
      %c0 = arith.constant 0 : index
      %16 = arith.index_cast %15 : i32 to index
      %17 = vector.load %arg3[%c0, %16] : memref<8x512xf32, #tpu.memory_space<vmem>>, vector<8x128xf32>
      %c0_7 = arith.constant 0 : index
      %18 = arith.index_cast %15 : i32 to index
      %19 = vector.load %arg4[%c0_7, %18] : memref<8x512xf32, #tpu.memory_space<vmem>>, vector<8x128xf32>
      %20 = arith.mulf %17, %19 : vector<8x128xf32>
      %21 = arith.addf %13, %20 : vector<8x128xf32>
      %22 = arith.mulf %17, %17 : vector<8x128xf32>
      %23 = arith.addf %13, %22 : vector<8x128xf32>
      %24 = arith.mulf %19, %19 : vector<8x128xf32>
      %25 = arith.addf %13, %24 : vector<8x128xf32>
      %c1_i32_8 = arith.constant 1 : i32
      %c128_i32_9 = arith.constant 128 : i32
      %26 = arith.muli %c1_i32_8, %c128_i32_9 : i32
      %27 = tpu.assume_multiple %26, 128 : i32
      %c0_10 = arith.constant 0 : index
      %28 = arith.index_cast %27 : i32 to index
      %29 = vector.load %arg3[%c0_10, %28] : memref<8x512xf32, #tpu.memory_space<vmem>>, vector<8x128xf32>
      %c0_11 = arith.constant 0 : index
      %30 = arith.index_cast %27 : i32 to index
      %31 = vector.load %arg4[%c0_11, %30] : memref<8x512xf32, #tpu.memory_space<vmem>>, vector<8x128xf32>
      %32 = arith.mulf %29, %31 : vector<8x128xf32>
      %33 = arith.addf %21, %32 : vector<8x128xf32>
      %34 = arith.mulf %29, %29 : vector<8x128xf32>
      %35 = arith.addf %23, %34 : vector<8x128xf32>
      %36 = arith.mulf %31, %31 : vector<8x128xf32>
      %37 = arith.addf %25, %36 : vector<8x128xf32>
      %c2_i32 = arith.constant 2 : i32
      %c128_i32_12 = arith.constant 128 : i32
      %38 = arith.muli %c2_i32, %c128_i32_12 : i32
      %39 = tpu.assume_multiple %38, 128 : i32
      %c0_13 = arith.constant 0 : index
      %40 = arith.index_cast %39 : i32 to index
      %41 = vector.load %arg3[%c0_13, %40] : memref<8x512xf32, #tpu.memory_space<vmem>>, vector<8x128xf32>
      %c0_14 = arith.constant 0 : index
      %42 = arith.index_cast %39 : i32 to index
      %43 = vector.load %arg4[%c0_14, %42] : memref<8x512xf32, #tpu.memory_space<vmem>>, vector<8x128xf32>
      %44 = arith.mulf %41, %43 : vector<8x128xf32>
      %45 = arith.addf %33, %44 : vector<8x128xf32>
      %46 = arith.mulf %41, %41 : vector<8x128xf32>
      %47 = arith.addf %35, %46 : vector<8x128xf32>
      %48 = arith.mulf %43, %43 : vector<8x128xf32>
      %49 = arith.addf %37, %48 : vector<8x128xf32>
      %c3_i32 = arith.constant 3 : i32
      %c128_i32_15 = arith.constant 128 : i32
      %50 = arith.muli %c3_i32, %c128_i32_15 : i32
      %51 = tpu.assume_multiple %50, 128 : i32
      %c0_16 = arith.constant 0 : index
      %52 = arith.index_cast %51 : i32 to index
      %53 = vector.load %arg3[%c0_16, %52] : memref<8x512xf32, #tpu.memory_space<vmem>>, vector<8x128xf32>
      %c0_17 = arith.constant 0 : index
      %54 = arith.index_cast %51 : i32 to index
      %55 = vector.load %arg4[%c0_17, %54] : memref<8x512xf32, #tpu.memory_space<vmem>>, vector<8x128xf32>
      %56 = arith.mulf %53, %55 : vector<8x128xf32>
      %57 = arith.addf %45, %56 : vector<8x128xf32>
      %58 = arith.mulf %53, %53 : vector<8x128xf32>
      %59 = arith.addf %47, %58 : vector<8x128xf32>
      %60 = arith.mulf %55, %55 : vector<8x128xf32>
      %61 = arith.addf %49, %60 : vector<8x128xf32>
      %c4_i32 = arith.constant 4 : i32
      %c0_18 = arith.constant 0 : index
      %c0_19 = arith.constant 0 : index
      %c0_20 = arith.constant 0 : index
      %62 = vector.load %arg5[%c0_18, %c0_19, %c0_20] : memref<1x8x128xf32, #tpu.memory_space<vmem>>, vector<1x8x128xf32>
      %63 = vector.shape_cast %62 : vector<1x8x128xf32> to vector<8x128xf32>
      %64 = arith.addf %63, %57 : vector<8x128xf32>
      %c0_21 = arith.constant 0 : index
      %c0_22 = arith.constant 0 : index
      %c0_23 = arith.constant 0 : index
      %65 = vector.load %arg5[%c0_21, %c0_22, %c0_23] : memref<1x8x128xf32, #tpu.memory_space<vmem>>, vector<1x8x128xf32>
      %66 = vector.shape_cast %65 : vector<1x8x128xf32> to vector<8x128xf32>
      %67 = vector.shape_cast %64 : vector<8x128xf32> to vector<1x8x128xf32>
      tpu.vector_store %arg5[%c0_21, %c0_22, %c0_23], %67 {strides = array<i32>} : memref<1x8x128xf32, #tpu.memory_space<vmem>>, vector<1x8x128xf32>,
      %c0_24 = arith.constant 0 : index
      %c0_25 = arith.constant 0 : index
      %c0_26 = arith.constant 0 : index
      %68 = vector.load %arg6[%c0_24, %c0_25, %c0_26] : memref<1x8x128xf32, #tpu.memory_space<vmem>>, vector<1x8x128xf32>
      %69 = vector.shape_cast %68 : vector<1x8x128xf32> to vector<8x128xf32>
      %70 = arith.addf %69, %59 : vector<8x128xf32>
      %c0_27 = arith.constant 0 : index
      %c0_28 = arith.constant 0 : index
      %c0_29 = arith.constant 0 : index
      %71 = vector.load %arg6[%c0_27, %c0_28, %c0_29] : memref<1x8x128xf32, #tpu.memory_space<vmem>>, vector<1x8x128xf32>
      %72 = vector.shape_cast %71 : vector<1x8x128xf32> to vector<8x128xf32>
      %73 = vector.shape_cast %70 : vector<8x128xf32> to vector<1x8x128xf32>
      tpu.vector_store %arg6[%c0_27, %c0_28, %c0_29], %73 {strides = array<i32>} : memref<1x8x128xf32, #tpu.memory_space<vmem>>, vector<1x8x128xf32>,
      %c0_30 = arith.constant 0 : index
      %c0_31 = arith.constant 0 : index
      %c0_32 = arith.constant 0 : index
      %74 = vector.load %arg7[%c0_30, %c0_31, %c0_32] : memref<1x8x128xf32, #tpu.memory_space<vmem>>, vector<1x8x128xf32>
      %75 = vector.shape_cast %74 : vector<1x8x128xf32> to vector<8x128xf32>
      %76 = arith.addf %75, %61 : vector<8x128xf32>
      %c0_33 = arith.constant 0 : index
      %c0_34 = arith.constant 0 : index
      %c0_35 = arith.constant 0 : index
      %77 = vector.load %arg7[%c0_33, %c0_34, %c0_35] : memref<1x8x128xf32, #tpu.memory_space<vmem>>, vector<1x8x128xf32>
      %78 = vector.shape_cast %77 : vector<1x8x128xf32> to vector<8x128xf32>
      %79 = vector.shape_cast %76 : vector<8x128xf32> to vector<1x8x128xf32>
      tpu.vector_store %arg7[%c0_33, %c0_34, %c0_35], %79 {strides = array<i32>} : memref<1x8x128xf32, #tpu.memory_space<vmem>>, vector<1x8x128xf32>,
    } else {
    }
    %c512_i32_4 = arith.constant 512 : i32
    %10 = arith.cmpi slt, %6, %c512_i32_4 : i32
    %11 = arith.extui %10 : i1 to i32
    %c0_i32_5 = arith.constant 0 : i32
    %12 = arith.cmpi ne, %11, %c0_i32_5 : i32
    scf.if %12 {
      %13 = tpu.iota {dimensions = array<i32: 1>} : vector<8x128xi32>
      %cst = arith.constant 0.000000e+00 : f32
      %14 = vector.broadcast %cst : f32 to vector<8x128xf32>
      %c0_i32_6 = arith.constant 0 : i32
      %c128_i32 = arith.constant 128 : i32
      %15 = arith.muli %c0_i32_6, %c128_i32 : i32
      %16 = tpu.assume_multiple %15, 128 : i32
      %c0 = arith.constant 0 : index
      %17 = arith.index_cast %16 : i32 to index
      %18 = vector.load %arg3[%c0, %17] : memref<8x512xf32, #tpu.memory_space<vmem>>, vector<8x128xf32>
      %c0_7 = arith.constant 0 : index
      %19 = arith.index_cast %16 : i32 to index
      %20 = vector.load %arg4[%c0_7, %19] : memref<8x512xf32, #tpu.memory_space<vmem>>, vector<8x128xf32>
      %c128_i32_8 = arith.constant 128 : i32
      %21 = arith.muli %c0_i32_6, %c128_i32_8 : i32
      %22 = vector.broadcast %21 : i32 to vector<8x128xi32>
      %23 = arith.addi %13, %22 : vector<8x128xi32>
      %24 = vector.broadcast %6 : i32 to vector<8x128xi32>
      %25 = arith.cmpi slt, %23, %24 : vector<8x128xi32>
      %cst_9 = arith.constant 0.000000e+00 : f32
      %26 = vector.broadcast %cst_9 : f32 to vector<8x128xf32>
      %27 = arith.select %25, %18, %26 : vector<8x128xi1>, vector<8x128xf32>
      %cst_10 = arith.constant 0.000000e+00 : f32
      %28 = vector.broadcast %cst_10 : f32 to vector<8x128xf32>
      %29 = arith.select %25, %20, %28 : vector<8x128xi1>, vector<8x128xf32>
      %30 = arith.mulf %27, %29 : vector<8x128xf32>
      %31 = arith.addf %14, %30 : vector<8x128xf32>
      %32 = arith.mulf %27, %27 : vector<8x128xf32>
      %33 = arith.addf %14, %32 : vector<8x128xf32>
      %34 = arith.mulf %29, %29 : vector<8x128xf32>
      %35 = arith.addf %14, %34 : vector<8x128xf32>
      %c1_i32_11 = arith.constant 1 : i32
      %c128_i32_12 = arith.constant 128 : i32
      %36 = arith.muli %c1_i32_11, %c128_i32_12 : i32
      %37 = tpu.assume_multiple %36, 128 : i32
      %c0_13 = arith.constant 0 : index
      %38 = arith.index_cast %37 : i32 to index
      %39 = vector.load %arg3[%c0_13, %38] : memref<8x512xf32, #tpu.memory_space<vmem>>, vector<8x128xf32>
      %c0_14 = arith.constant 0 : index
      %40 = arith.index_cast %37 : i32 to index
      %41 = vector.load %arg4[%c0_14, %40] : memref<8x512xf32, #tpu.memory_space<vmem>>, vector<8x128xf32>
      %c128_i32_15 = arith.constant 128 : i32
      %42 = arith.muli %c1_i32_11, %c128_i32_15 : i32
      %43 = vector.broadcast %42 : i32 to vector<8x128xi32>
      %44 = arith.addi %13, %43 : vector<8x128xi32>
      %45 = vector.broadcast %6 : i32 to vector<8x128xi32>
      %46 = arith.cmpi slt, %44, %45 : vector<8x128xi32>
      %cst_16 = arith.constant 0.000000e+00 : f32
      %47 = vector.broadcast %cst_16 : f32 to vector<8x128xf32>
      %48 = arith.select %46, %39, %47 : vector<8x128xi1>, vector<8x128xf32>
      %cst_17 = arith.constant 0.000000e+00 : f32
      %49 = vector.broadcast %cst_17 : f32 to vector<8x128xf32>
      %50 = arith.select %46, %41, %49 : vector<8x128xi1>, vector<8x128xf32>
      %51 = arith.mulf %48, %50 : vector<8x128xf32>
      %52 = arith.addf %31, %51 : vector<8x128xf32>
      %53 = arith.mulf %48, %48 : vector<8x128xf32>
      %54 = arith.addf %33, %53 : vector<8x128xf32>
      %55 = arith.mulf %50, %50 : vector<8x128xf32>
      %56 = arith.addf %35, %55 : vector<8x128xf32>
      %c2_i32 = arith.constant 2 : i32
      %c128_i32_18 = arith.constant 128 : i32
      %57 = arith.muli %c2_i32, %c128_i32_18 : i32
      %58 = tpu.assume_multiple %57, 128 : i32
      %c0_19 = arith.constant 0 : index
      %59 = arith.index_cast %58 : i32 to index
      %60 = vector.load %arg3[%c0_19, %59] : memref<8x512xf32, #tpu.memory_space<vmem>>, vector<8x128xf32>
      %c0_20 = arith.constant 0 : index
      %61 = arith.index_cast %58 : i32 to index
      %62 = vector.load %arg4[%c0_20, %61] : memref<8x512xf32, #tpu.memory_space<vmem>>, vector<8x128xf32>
      %c128_i32_21 = arith.constant 128 : i32
      %63 = arith.muli %c2_i32, %c128_i32_21 : i32
      %64 = vector.broadcast %63 : i32 to vector<8x128xi32>
      %65 = arith.addi %13, %64 : vector<8x128xi32>
      %66 = vector.broadcast %6 : i32 to vector<8x128xi32>
      %67 = arith.cmpi slt, %65, %66 : vector<8x128xi32>
      %cst_22 = arith.constant 0.000000e+00 : f32
      %68 = vector.broadcast %cst_22 : f32 to vector<8x128xf32>
      %69 = arith.select %67, %60, %68 : vector<8x128xi1>, vector<8x128xf32>
      %cst_23 = arith.constant 0.000000e+00 : f32
      %70 = vector.broadcast %cst_23 : f32 to vector<8x128xf32>
      %71 = arith.select %67, %62, %70 : vector<8x128xi1>, vector<8x128xf32>
      %72 = arith.mulf %69, %71 : vector<8x128xf32>
      %73 = arith.addf %52, %72 : vector<8x128xf32>
      %74 = arith.mulf %69, %69 : vector<8x128xf32>
      %75 = arith.addf %54, %74 : vector<8x128xf32>
      %76 = arith.mulf %71, %71 : vector<8x128xf32>
      %77 = arith.addf %56, %76 : vector<8x128xf32>
      %c3_i32 = arith.constant 3 : i32
      %c128_i32_24 = arith.constant 128 : i32
      %78 = arith.muli %c3_i32, %c128_i32_24 : i32
      %79 = tpu.assume_multiple %78, 128 : i32
      %c0_25 = arith.constant 0 : index
      %80 = arith.index_cast %79 : i32 to index
      %81 = vector.load %arg3[%c0_25, %80] : memref<8x512xf32, #tpu.memory_space<vmem>>, vector<8x128xf32>
      %c0_26 = arith.constant 0 : index
      %82 = arith.index_cast %79 : i32 to index
      %83 = vector.load %arg4[%c0_26, %82] : memref<8x512xf32, #tpu.memory_space<vmem>>, vector<8x128xf32>
      %c128_i32_27 = arith.constant 128 : i32
      %84 = arith.muli %c3_i32, %c128_i32_27 : i32
      %85 = vector.broadcast %84 : i32 to vector<8x128xi32>
      %86 = arith.addi %13, %85 : vector<8x128xi32>
      %87 = vector.broadcast %6 : i32 to vector<8x128xi32>
      %88 = arith.cmpi slt, %86, %87 : vector<8x128xi32>
      %cst_28 = arith.constant 0.000000e+00 : f32
      %89 = vector.broadcast %cst_28 : f32 to vector<8x128xf32>
      %90 = arith.select %88, %81, %89 : vector<8x128xi1>, vector<8x128xf32>
      %cst_29 = arith.constant 0.000000e+00 : f32
      %91 = vector.broadcast %cst_29 : f32 to vector<8x128xf32>
      %92 = arith.select %88, %83, %91 : vector<8x128xi1>, vector<8x128xf32>
      %93 = arith.mulf %90, %92 : vector<8x128xf32>
      %94 = arith.addf %73, %93 : vector<8x128xf32>
      %95 = arith.mulf %90, %90 : vector<8x128xf32>
      %96 = arith.addf %75, %95 : vector<8x128xf32>
      %97 = arith.mulf %92, %92 : vector<8x128xf32>
      %98 = arith.addf %77, %97 : vector<8x128xf32>
      %c4_i32 = arith.constant 4 : i32
      %c0_30 = arith.constant 0 : index
      %c0_31 = arith.constant 0 : index
      %c0_32 = arith.constant 0 : index
      %99 = vector.load %arg5[%c0_30, %c0_31, %c0_32] : memref<1x8x128xf32, #tpu.memory_space<vmem>>, vector<1x8x128xf32>
      %100 = vector.shape_cast %99 : vector<1x8x128xf32> to vector<8x128xf32>
      %101 = arith.addf %100, %94 : vector<8x128xf32>
      %c0_33 = arith.constant 0 : index
      %c0_34 = arith.constant 0 : index
      %c0_35 = arith.constant 0 : index
      %102 = vector.load %arg5[%c0_33, %c0_34, %c0_35] : memref<1x8x128xf32, #tpu.memory_space<vmem>>, vector<1x8x128xf32>
      %103 = vector.shape_cast %102 : vector<1x8x128xf32> to vector<8x128xf32>
      %104 = vector.shape_cast %101 : vector<8x128xf32> to vector<1x8x128xf32>
      tpu.vector_store %arg5[%c0_33, %c0_34, %c0_35], %104 {strides = array<i32>} : memref<1x8x128xf32, #tpu.memory_space<vmem>>, vector<1x8x128xf32>,
      %c0_36 = arith.constant 0 : index
      %c0_37 = arith.constant 0 : index
      %c0_38 = arith.constant 0 : index
      %105 = vector.load %arg6[%c0_36, %c0_37, %c0_38] : memref<1x8x128xf32, #tpu.memory_space<vmem>>, vector<1x8x128xf32>
      %106 = vector.shape_cast %105 : vector<1x8x128xf32> to vector<8x128xf32>
      %107 = arith.addf %106, %96 : vector<8x128xf32>
      %c0_39 = arith.constant 0 : index
      %c0_40 = arith.constant 0 : index
      %c0_41 = arith.constant 0 : index
      %108 = vector.load %arg6[%c0_39, %c0_40, %c0_41] : memref<1x8x128xf32, #tpu.memory_space<vmem>>, vector<1x8x128xf32>
      %109 = vector.shape_cast %108 : vector<1x8x128xf32> to vector<8x128xf32>
      %110 = vector.shape_cast %107 : vector<8x128xf32> to vector<1x8x128xf32>
      tpu.vector_store %arg6[%c0_39, %c0_40, %c0_41], %110 {strides = array<i32>} : memref<1x8x128xf32, #tpu.memory_space<vmem>>, vector<1x8x128xf32>,
      %c0_42 = arith.constant 0 : index
      %c0_43 = arith.constant 0 : index
      %c0_44 = arith.constant 0 : index
      %111 = vector.load %arg7[%c0_42, %c0_43, %c0_44] : memref<1x8x128xf32, #tpu.memory_space<vmem>>, vector<1x8x128xf32>
      %112 = vector.shape_cast %111 : vector<1x8x128xf32> to vector<8x128xf32>
      %113 = arith.addf %112, %98 : vector<8x128xf32>
      %c0_45 = arith.constant 0 : index
      %c0_46 = arith.constant 0 : index
      %c0_47 = arith.constant 0 : index
      %114 = vector.load %arg7[%c0_45, %c0_46, %c0_47] : memref<1x8x128xf32, #tpu.memory_space<vmem>>, vector<1x8x128xf32>
      %115 = vector.shape_cast %114 : vector<1x8x128xf32> to vector<8x128xf32>
      %116 = vector.shape_cast %113 : vector<8x128xf32> to vector<1x8x128xf32>
      tpu.vector_store %arg7[%c0_45, %c0_46, %c0_47], %116 {strides = array<i32>} : memref<1x8x128xf32, #tpu.memory_space<vmem>>, vector<1x8x128xf32>,
    } else {
    }
    return
  }
  func.func @transform_0(%arg0: i32, %arg1: i32, %arg2: i32) -> (i32, i32) {
    %c1_i32 = arith.constant 1 : i32
    %0 = arith.muli %arg0, %c1_i32 : i32
    %1 = arith.addi %0, %arg2 : i32
    %c0_i32 = arith.constant 0 : i32
    %2 = arith.minsi %1, %c0_i32 : i32
    %c0_i32_0 = arith.constant 0 : i32
    return %arg1, %2 : i32, i32
  }
  func.func @transform_1(%arg0: i32, %arg1: i32, %arg2: i32) -> (i32, i32) {
    %c1_i32 = arith.constant 1 : i32
    %0 = arith.muli %arg0, %c1_i32 : i32
    %1 = arith.addi %0, %arg2 : i32
    %c0_i32 = arith.constant 0 : i32
    %2 = arith.minsi %1, %c0_i32 : i32
    %c0_i32_0 = arith.constant 0 : i32
    return %arg1, %2 : i32, i32
  }
  func.func @transform_2(%arg0: i32, %arg1: i32, %arg2: i32) -> (i32, i32, i32) {
    %c0_i32 = arith.constant 0 : i32
    %c0_i32_0 = arith.constant 0 : i32
    return %arg0, %arg1, %c0_i32 : i32, i32, i32
  }
  func.func @transform_3(%arg0: i32, %arg1: i32, %arg2: i32) -> (i32, i32, i32) {
    %c0_i32 = arith.constant 0 : i32
    %c0_i32_0 = arith.constant 0 : i32
    return %arg0, %arg1, %c0_i32 : i32, i32, i32
  }
  func.func @transform_4(%arg0: i32, %arg1: i32, %arg2: i32) -> (i32, i32, i32) {
    %c0_i32 = arith.constant 0 : i32
    %c0_i32_0 = arith.constant 0 : i32
    return %arg0, %arg1, %c0_i32 : i32, i32, i32
  }
}

</mosaic_0001>

<bundles_post_ra>
// kernel: _lambda_.1
= control target key start
LH: loop header
LB: loop body
LE: loop exit
PB: predicated region body
PF: predicated region fallthrough
CT: control target
= control target key end

     0   :  { %s303_s0 = inlined_call_operand.vmem [shape: f32[8,512], index: 0, kind: input, shape index: {}]   ;;  %s304_s1 = inlined_call_operand.vmem [shape: f32[8,512], index: 1, kind: input, shape index: {}]   ;;  %s305_s3 = inlined_call_operand.vmem [shape: f32[1,8,128], index: 3, kind: output, shape index: {1}]   ;;  %s306_s2 = inlined_call_operand.vmem [shape: f32[1,8,128], index: 2, kind: output, shape index: {0}]   ;;  %s307_s4 = inlined_call_operand.vmem [shape: f32[1,8,128], index: 4, kind: output, shape index: {2}]  }
   0x1   :  { %v92_v0 = vld [vmem:[%s303_s0] sm:$0xff]  ;;  %v232_v2 = vld [vmem:[%s303_s0 + $0x8] sm:$0xff]  ;;  %v234_v5 = vld [vmem:[%s303_s0 + $0x10] sm:$0xff] }
   0x2   :  { %v93_v1 = vld [vmem:[%s304_s1] sm:$0xff]  ;;  %v233_v4 = vld [vmem:[%s304_s1 + $0x8] sm:$0xff]  ;;  %v235_v6 = vld [vmem:[%s304_s1 + $0x10] sm:$0xff]  ;;  %v96_v7 = vmul.f32 %v92_v0, %v92_v0  ;;  %v106_v8 = vmul.f32 %v232_v2, %v232_v2  ;;  %v116_v14 = vmul.f32 %v234_v5, %v234_v5 }
   0x3   :  { %v94_v3 = vmul.f32 %v93_v1, %v92_v0  ;;  %v98_v9 = vmul.f32 %v93_v1, %v93_v1  ;;  %v104_v10 = vmul.f32 %v233_v4, %v232_v2  ;;  %v114_v11 = vmul.f32 %v235_v6, %v234_v5  ;;  %v236_v12 = vld [vmem:[%s303_s0 + $0x18] sm:$0xff] }
   0x4   :  { %v237_v13 = vld [vmem:[%s304_s1 + $0x18] sm:$0xff]  ;;  %v108_v15 = vmul.f32 %v233_v4, %v233_v4  ;;  %v107_v16 = vadd.f32 %v106_v8, %v96_v7  ;;  %v126_v17 = vmul.f32 %v236_v12, %v236_v12  ;;  %v118_v18 = vmul.f32 %v235_v6, %v235_v6 }
   0x5   :  { %v105_v19 = vadd.f32 %v104_v10, %v94_v3  ;;  %v124_v20 = vmul.f32 %v237_v13, %v236_v12  ;;  %v128_v22 = vmul.f32 %v237_v13, %v237_v13 }
   0x6   :  { %v109_v21 = vadd.f32 %v108_v15, %v98_v9  ;;  %v117_v23 = vadd.f32 %v116_v14, %v107_v16 }
   0x7   :  { %v115_v24 = vadd.f32 %v114_v11, %v105_v19 }
   0x8   :  { %v119_v25 = vadd.f32 %v118_v18, %v109_v21  ;;  %v127_v26 = vadd.f32 %v126_v17, %v117_v23 }
   0x9   :  { %v125_v27 = vadd.f32 %v124_v20, %v115_v24 }
   0xa   :  { %v129_v28 = vadd.f32 %v128_v22, %v119_v25  ;;  %135 = vst [vmem:[%s305_s3] sm:$0xff] %v127_v26 }
   0xb   :  { %132 = vst [vmem:[%s306_s2] sm:$0xff] %v125_v27 }
   0xc   :  { %138 = vst [vmem:[%s307_s4] sm:$0xff] %v129_v28 }

</bundles_post_ra>
